<compile_context>
chip_gen: v7x
topology: tpu7x:2x2x1
jax: 0.10.0
libtpu: 0.0.40
codegen_flags: <defaults>
</compile_context>

<pallas_src>
import math

import jax
import jax.numpy as jnp
from jax.experimental import pallas as pl
from jax.experimental.pallas import tpu as pltpu


# ----------------------------- Pallas kernel ------------------------------- #

def _copy_kernel(x_ref, o_ref):
    # Identity copy of one (N, tile_f) lane-dense block.
    o_ref[...] = x_ref[...]


# ------------------------------ JAX wrapper -------------------------------- #

def _feature_tile(f: int) -> int:
    """Largest lane-dense tile (multiple of 128) dividing F that still yields
    >= 2 grid steps (so v7x megacore has something to shard); else the full
    axis (a block dim equal to the array dim is always legal)."""
    for t in (2048, 1024, 512, 256, 128):
        if f % t == 0 and f // t >= 2:
            return t
    return f


def unflatten(x):
    """x: (N, ...) -> (N, prod(rest), 1, 1), matching torch x.view(N, -1, 1, 1)."""
    n = x.shape[0]
    f = int(math.prod(x.shape[1:]))
    x2 = x.reshape(n, f)                       # row-major flatten == torch .view
    tf = _feature_tile(f)
    grid = (f // tf,)
    flat = pl.pallas_call(
        _copy_kernel,
        out_shape=jax.ShapeDtypeStruct((n, f), x.dtype),
        grid=grid,
        in_specs=[pl.BlockSpec((n, tf), lambda j: (0, j))],
        out_specs=pl.BlockSpec((n, tf), lambda j: (0, j)),
        compiler_params=pltpu.CompilerParams(
            dimension_semantics=("parallel",)),
    )(x2)
    # Trailing singleton dims are metadata only.
    return flat.reshape(n, f, 1, 1)


if __name__ == "__main__":
    key = jax.random.PRNGKey(0)
    x = jax.random.normal(key, (2, 4, 16, 16), jnp.float32)   # NCHW like PyTorch

    out = jax.jit(unflatten)(x)
    out = jax.block_until_ready(out)

    assert out.shape == (2, 4 * 16 * 16, 1, 1), out.shape
    ref = x.reshape(x.shape[0], -1, 1, 1)                     # torch.view semantics
    if not jnp.array_equal(out, ref):
        err = float(jnp.max(jnp.abs(out - ref)))
        raise AssertionError(f"mismatch vs reference view, max abs err = {err}")

    print("KERNEL_OK")
</pallas_src>

<mosaic_0001>
module attributes {stable_mosaic.version = 11 : i64} {
  func.func @_copy_kernel(%arg0: i32, %arg1: memref<2x512xf32, #tpu.memory_space<vmem>>, %arg2: memref<2x512xf32, #tpu.memory_space<vmem>>) attributes {dimension_semantics = [#tpu.dimension_semantics<parallel>], iteration_bounds = array<i64: 2>, scalar_prefetch = 0 : i64, scratch_operands = 0 : i64, tpu.core_type = #tpu.core_type<tc>, window_params = [{transform_indices = @transform_0, window_bounds = array<i64: 2, 512>}, {transform_indices = @transform_1, window_bounds = array<i64: 2, 512>}]} {
    %c0 = arith.constant 0 : index
    %c0_0 = arith.constant 0 : index
    %0 = vector.load %arg1[%c0, %c0_0] : memref<2x512xf32, #tpu.memory_space<vmem>>, vector<2x512xf32>
    %c0_1 = arith.constant 0 : index
    %c0_2 = arith.constant 0 : index
    %1 = vector.load %arg2[%c0_1, %c0_2] : memref<2x512xf32, #tpu.memory_space<vmem>>, vector<2x512xf32>
    tpu.vector_store %arg2[%c0_1, %c0_2], %0 {strides = array<i32>} : memref<2x512xf32, #tpu.memory_space<vmem>>, vector<2x512xf32>,
    return
  }
  func.func @transform_0(%arg0: i32) -> (i32, i32) {
    %c0_i32 = arith.constant 0 : i32
    %c0_i32_0 = arith.constant 0 : i32
    return %c0_i32, %arg0 : i32, i32
  }
  func.func @transform_1(%arg0: i32) -> (i32, i32) {
    %c0_i32 = arith.constant 0 : i32
    %c0_i32_0 = arith.constant 0 : i32
    return %c0_i32, %arg0 : i32, i32
  }
}

</mosaic_0001>

<bundles_post_ra>
// kernel: unflatten.1
= control target key start
LH: loop header
LB: loop body
LE: loop exit
PB: predicated region body
PF: predicated region fallthrough
CT: control target
= control target key end

     0   :  { %s201_s6 = smov 0   ;;  %s221_s0 = inlined_call_operand.vmem [shape: f32[2,1024], index: 0, kind: input, shape index: {}]   ;;  %s222_s1 = inlined_call_operand.vmem [shape: f32[2,1024], index: 1, kind: output, shape index: {}]  }
   0x1 LB: > { %s178_s7 = sadd.s32 4294967295, %s203_s6   ;;  %p182_p0 = scmp.ge.s32.totalorder %s203_s6, 1  ;;  %s203_s6 = sphi %s201_s6, %s11_s6  }
   0x2   : > { %p88_p1 = scmp.lt.s32.totalorder %s203_s6, 3 }
   0x4   : > { %p89_p2 = pnand %p182_p0, %p88_p1 }
   0x5   : > { %s183_s8 = sshll.u32 (!%p89_p2), %s178_s7, 2 }
   0x6   : > { %92 = sbr.rel (%p89_p2) target bundleno = 18 (0x12), region = 24  ;;  %p109_p3 = scmp.lt.s32.totalorder (!%p89_p2), %s183_s8, 7 }
   0xd   : > { %s224_s8 = smov (!%p109_p3, %s183_s8), 7 }
   0xe   : > { %s184_s9 = sshll.u32 %s224_s8, 1 }
   0xf   : > { %s112_s12 = scalar_lea.vmem %s221_s0, %s184_s9  ;;  %s118_s15 = scalar_lea.vmem %s222_s1, %s184_s9 }
  0x10   : > { %v120_v0 = vld [vmem:[%s112_s12] sm:$0xff] }
  0x11   : > { %121 = vst [vmem:[%s118_s15] sm:$0xff] %v120_v0 }
  0x12 PF: > { %s11_s6 = sadd.s32 1, %s203_s6  }
  0x13   : > { %p8_p4 = scmp.ge.s32.totalorder %s11_s6, 4  }
  0x15   :  { %10 = sbr.rel (!%p8_p4) target bundleno = 1 (0x1), region = 54 }

</bundles_post_ra>
